<compile_context>
chip_gen: v6e
topology: v6e:2x2x1
jax: 0.10.0
libtpu: 0.0.40
codegen_flags: <defaults>
</compile_context>

<pallas_src>
import jax
import jax.numpy as jnp
from jax import lax
from jax.experimental import pallas as pl
from jax.experimental.pallas import tpu as pltpu


# --------------------------------------------------------------------------
# Kernel
# --------------------------------------------------------------------------
def _resnet_block_kernel(x_ref, ra_ref, b1_ref, r2_ref, b2_ref, out_ref):
    # x_ref  : (B_TILE, H, W*C1)        bf16  lane-dense NHWC rows (W, C merged)
    # ra_ref : (3*W*C1, 2*W*C2)         bf16  [conv1 Toeplitz | center-tap 1x1 id]
    # b1_ref : (1, W*C2)                f32   conv1 folded-BN bias, tiled over W
    # r2_ref : (3*W*C2, W*C2)           bf16  conv2 Toeplitz RHS (kh folded into K)
    # b2_ref : (1, W*C2)                f32   (b2 + b_identity), tiled over W
    # out_ref: (B_TILE, H, W*C2)        f32
    bt, h, wc1 = x_ref.shape
    wc2 = b1_ref.shape[-1]
    m = bt * h

    xb = x_ref[...].reshape(m, wc1)                      # (M, W*C1) bf16

    # Per-image H-halo masks on the tall row axis: rows at h==0 / h==H-1 of each
    # image must see zeros from the shifted neighbor (no cross-image leakage).
    row = lax.broadcasted_iota(jnp.int32, (m, 1), 0)
    rmod = row % h
    not_top = rmod != 0
    not_bot = rmod != (h - 1)

    def prev_row(a):
        # b[r] = a[r-1], zeroed at each image's first row.
        z = jnp.zeros((1, a.shape[1]), a.dtype)
        s = jnp.concatenate([z, a[:-1, :]], axis=0)
        return jnp.where(not_top, s, jnp.zeros_like(s))

    def next_row(a):
        # b[r] = a[r+1], zeroed at each image's last row.
        z = jnp.zeros((1, a.shape[1]), a.dtype)
        s = jnp.concatenate([a[1:, :], z], axis=0)
        return jnp.where(not_bot, s, jnp.zeros_like(s))

    # ---- conv1 (3x3, pad 1) + 1x1 identity conv fused into ONE MXU matmul ----
    # LHS stacks the three kh-shifted row sets along K; RHS columns [0:W*C2) are
    # conv1, columns [W*C2:2*W*C2) are the identity conv (center tap only).
    lhs1 = jnp.concatenate([prev_row(xb), xb, next_row(xb)], axis=1)   # (M, 3*W*C1)
    res = jnp.dot(lhs1, ra_ref[...], preferred_element_type=jnp.float32)  # (M, 2*W*C2)
    h1 = jnp.maximum(res[:, :wc2] + b1_ref[...], 0.0)    # conv1 + BN + ReLU, f32
    acc = res[:, wc2:]                                    # identity branch acc, f32

    # ---- conv2 (3x3) + folded BN: one matmul accumulated onto the identity ----
    h1b = h1.astype(jnp.bfloat16)
    lhs2 = jnp.concatenate([prev_row(h1b), h1b, next_row(h1b)], axis=1)  # (M, 3*W*C2)
    acc = acc + jnp.dot(lhs2, r2_ref[...], preferred_element_type=jnp.float32)

    # ---- SE is Identity (se_ratio=None); residual already in acc; final ReLU ----
    out = jnp.maximum(acc + b2_ref[...], 0.0)
    out_ref[...] = out.reshape(bt, h, wc2).astype(out_ref.dtype)


# --------------------------------------------------------------------------
# Wrapper (weight prep + pallas_call)
# --------------------------------------------------------------------------
def _toeplitz_rhs_3x3(w_hwio, W):
    """(3,3,Cin,Cout) BN-folded weights -> (3, W*Cin, W*Cout) banded RHS.

    R[kh, u*Cin+c, w*Cout+n] = w[kh, u-w+1, c, n] if 0 <= u-w+1 < 3 else 0.
    Folds the width axis (including its zero padding) into the matmul.
    """
    _, _, Cin, Cout = w_hwio.shape
    u = jnp.arange(W)[:, None]
    wpos = jnp.arange(W)[None, :]
    d = u - wpos + 1                                          # (W, W)
    valid = ((d >= 0) & (d < 3))[None, :, :, None, None]      # (1,W,W,1,1)
    dc = jnp.clip(d, 0, 2)
    gathered = w_hwio[:, dc, :, :]                            # (3,W,W,Cin,Cout)
    banded = jnp.where(valid, gathered, 0.0)
    banded = jnp.transpose(banded, (0, 1, 3, 2, 4))           # (3,W,Cin,W,Cout)
    return banded.reshape(3, W * Cin, W * Cout)


def _toeplitz_rhs_1x1(w_io, W):
    """(Cin, Cout) 1x1 conv -> (W*Cin, W*Cout) block-diagonal RHS."""
    Cin, Cout = w_io.shape
    eye = jnp.eye(W, dtype=w_io.dtype)
    r = eye[:, None, :, None] * w_io[None, :, None, :]        # (W,Cin,W,Cout)
    return r.reshape(W * Cin, W * Cout)


def resnet_basic_block(x_nchw, w1, b1, w2, b2, wid, bid, *, b_tile=None):
    """x_nchw: (N, C1, H, W) f32. Weights BN-folded, HWIO layout ((C1,C2) for wid).

    b_tile: batch rows per grid step. Default = whole batch in one fat step
    (best on single-TC v5e/v6e); on v7x pass b_tile = pl.cdiv(N, 2) so each of
    the 2 TensorCores gets one fat parallel step.
    """
    N, C1, H, W = x_nchw.shape
    C2 = w1.shape[-1]
    if b_tile is None:
        b_tile = N
    assert N % b_tile == 0, "batch must be divisible by b_tile"

    # NCHW (PyTorch boundary) -> lane-dense bf16 (N, H, W*C1) rows. In a real
    # NHWC pipeline these transposes disappear; the reshape itself is free.
    x_rows = jnp.transpose(x_nchw, (0, 2, 3, 1)).reshape(N, H, W * C1)
    x_rows = x_rows.astype(jnp.bfloat16)

    # conv1 RHS with the kh taps flattened into K, and the 1x1 identity conv
    # appended as extra output columns aligned with the center (kh=1) K block.
    r1_flat = _toeplitz_rhs_3x3(w1, W).reshape(3 * W * C1, W * C2)
    rid_pad = jnp.concatenate(
        [jnp.zeros((W * C1, W * C2), w1.dtype),
         _toeplitz_rhs_1x1(wid, W),
         jnp.zeros((W * C1, W * C2), w1.dtype)], axis=0)      # (3*W*C1, W*C2)
    ra = jnp.concatenate([r1_flat, rid_pad], axis=1).astype(jnp.bfloat16)  # (3*W*C1, 2*W*C2)
    r2 = _toeplitz_rhs_3x3(w2, W).reshape(3 * W * C2, W * C2).astype(jnp.bfloat16)
    b1d = jnp.tile(b1, W).reshape(1, W * C2).astype(jnp.float32)
    b2d = jnp.tile(b2 + bid, W).reshape(1, W * C2).astype(jnp.float32)

    grid = (N // b_tile,)
    out_rows = pl.pallas_call(
        _resnet_block_kernel,
        grid=grid,
        out_shape=jax.ShapeDtypeStruct((N, H, W * C2), jnp.float32),
        in_specs=[
            pl.BlockSpec((b_tile, H, W * C1), lambda b: (b, 0, 0)),
            pl.BlockSpec((3 * W * C1, 2 * W * C2), lambda b: (0, 0)),
            pl.BlockSpec((1, W * C2), lambda b: (0, 0)),
            pl.BlockSpec((3 * W * C2, W * C2), lambda b: (0, 0)),
            pl.BlockSpec((1, W * C2), lambda b: (0, 0)),
        ],
        out_specs=pl.BlockSpec((b_tile, H, W * C2), lambda b: (b, 0, 0)),
        compiler_params=pltpu.CompilerParams(
            dimension_semantics=("parallel",)),
    )(x_rows, ra, b1d, r2, b2d)

    out = out_rows.reshape(N, H, W, C2)
    return jnp.transpose(out, (0, 3, 1, 2))                   # back to NCHW


# --------------------------------------------------------------------------
# Reference / test harness
# --------------------------------------------------------------------------
def _fold_bn(w_hwio, gamma, beta, mean, var, eps=1e-5):
    s = gamma / jnp.sqrt(var + eps)
    return w_hwio * s, beta - mean * s


def _reference_nhwc(x_nhwc, w1, b1, w2, b2, wid, bid):
    # Pure-JAX f32 reference for the module's forward pass.
    def conv(x, w, b, relu):
        y = jax.lax.conv_general_dilated(
            x, w, window_strides=(1, 1), padding="SAME",
            dimension_numbers=("NHWC", "HWIO", "NHWC"))
        y = y + b
        return jnp.maximum(y, 0.0) if relu else y
    h = conv(x_nhwc, w1, b1, True)
    h = conv(h, w2, b2, False)
    ident = conv(x_nhwc, wid.reshape(1, 1, *wid.shape), bid, False)
    return jnp.maximum(h + ident, 0.0)


if __name__ == "__main__":
    N, C1, H, W = 2, 4, 16, 16
    C2 = 8

    key = jax.random.PRNGKey(0)
    ks = jax.random.split(key, 20)
    x = jax.random.normal(ks[0], (N, C1, H, W), jnp.float32)

    def make_bn(k0, k1, k2, k3, c):
        gamma = jax.random.uniform(k0, (c,), jnp.float32, 0.8, 1.2)
        beta = 0.1 * jax.random.normal(k1, (c,), jnp.float32)
        mean = 0.1 * jax.random.normal(k2, (c,), jnp.float32)
        var = jax.random.uniform(k3, (c,), jnp.float32, 0.5, 1.5)
        return gamma, beta, mean, var

    # conv1: 3x3 C1->C2 (HWIO), conv2: 3x3 C2->C2, identity: 1x1 C1->C2
    w1_raw = 0.1 * jax.random.normal(ks[1], (3, 3, C1, C2), jnp.float32)
    w2_raw = 0.1 * jax.random.normal(ks[2], (3, 3, C2, C2), jnp.float32)
    wid_raw = 0.1 * jax.random.normal(ks[3], (C1, C2), jnp.float32)

    w1, b1 = _fold_bn(w1_raw, *make_bn(ks[4], ks[5], ks[6], ks[7], C2))
    w2, b2 = _fold_bn(w2_raw, *make_bn(ks[8], ks[9], ks[10], ks[11], C2))
    wid, bid = _fold_bn(wid_raw, *make_bn(ks[12], ks[13], ks[14], ks[15], C2))

    block = jax.jit(resnet_basic_block)
    out = block(x, w1, b1, w2, b2, wid, bid)
    out = jax.block_until_ready(out)

    # sanity check against a pure-JAX f32 reference (kernel uses bf16 MXU
    # inputs with f32 accumulation, hence the loose-but-safe tolerance).
    x_nhwc = jnp.transpose(x, (0, 2, 3, 1))
    ref = _reference_nhwc(x_nhwc, w1, b1, w2, b2, wid, bid)
    ref = jnp.transpose(ref, (0, 3, 1, 2))
    assert out.shape == (N, C2, H, W)
    assert jnp.allclose(out, ref, rtol=2e-2, atol=2e-2), "mismatch vs JAX reference"

    print("KERNEL_OK")
</pallas_src>

<mosaic_0001>
module attributes {stable_mosaic.version = 11 : i64} {
  func.func @_resnet_block_kernel(%arg0: i32, %arg1: memref<2x16x64xbf16, #tpu.memory_space<vmem>>, %arg2: memref<192x256xbf16, #tpu.memory_space<vmem>>, %arg3: memref<1x128xf32, #tpu.memory_space<vmem>>, %arg4: memref<384x128xbf16, #tpu.memory_space<vmem>>, %arg5: memref<1x128xf32, #tpu.memory_space<vmem>>, %arg6: memref<2x16x128xf32, #tpu.memory_space<vmem>>) attributes {dimension_semantics = [#tpu.dimension_semantics<parallel>], iteration_bounds = array<i64: 1>, scalar_prefetch = 0 : i64, scratch_operands = 0 : i64, tpu.core_type = #tpu.core_type<tc>, window_params = [{transform_indices = @transform_0, window_bounds = array<i64: 2, 16, 64>}, {pipeline_mode = #tpu.pipeline_mode<synchronous>, transform_indices = @transform_1, window_bounds = array<i64: 192, 256>}, {pipeline_mode = #tpu.pipeline_mode<synchronous>, transform_indices = @transform_2, window_bounds = array<i64: 1, 128>}, {pipeline_mode = #tpu.pipeline_mode<synchronous>, transform_indices = @transform_3, window_bounds = array<i64: 384, 128>}, {pipeline_mode = #tpu.pipeline_mode<synchronous>, transform_indices = @transform_4, window_bounds = array<i64: 1, 128>}, {transform_indices = @transform_5, window_bounds = array<i64: 2, 16, 128>}]} {
    %c0 = arith.constant 0 : index
    %c0_0 = arith.constant 0 : index
    %c0_1 = arith.constant 0 : index
    %0 = vector.load %arg1[%c0, %c0_0, %c0_1] : memref<2x16x64xbf16, #tpu.memory_space<vmem>>, vector<2x16x64xbf16>
    %1 = vector.shape_cast %0 : vector<2x16x64xbf16> to vector<32x64xbf16>
    %2 = tpu.iota {dimensions = array<i32: 0>} : vector<32x1xi32>
    %c16_i32 = arith.constant 16 : i32
    %c0_i32 = arith.constant 0 : i32
    %3 = arith.cmpi eq, %c16_i32, %c0_i32 : i32
    %c1_i32 = arith.constant 1 : i32
    %4 = arith.select %3, %c1_i32, %c16_i32 : i32
    %5 = vector.broadcast %4 : i32 to vector<32x1xi32>
    %6 = arith.remsi %2, %5 : vector<32x1xi32>
    %c0_i32_2 = arith.constant 0 : i32
    %7 = vector.broadcast %c0_i32_2 : i32 to vector<32x1xi32>
    %8 = arith.cmpi ne, %6, %7 : vector<32x1xi32>
    %c0_i32_3 = arith.constant 0 : i32
    %9 = vector.broadcast %c0_i32_3 : i32 to vector<32x1xi32>
    %10 = arith.cmpi slt, %6, %9 : vector<32x1xi32>
    %c0_i32_4 = arith.constant 0 : i32
    %11 = arith.cmpi slt, %4, %c0_i32_4 : i32
    %12 = vector.broadcast %11 : i1 to vector<32x1xi1>
    %13 = vector.broadcast %12 : vector<32x1xi1> to vector<32x1xi1>
    %14 = arith.xori %10, %13 : vector<32x1xi1>
    %15 = arith.andi %14, %8 : vector<32x1xi1>
    %16 = vector.broadcast %4 : i32 to vector<32x1xi32>
    %17 = arith.addi %6, %16 : vector<32x1xi32>
    %18 = arith.select %15, %17, %6 : vector<32x1xi1>, vector<32x1xi32>
    %c0_i32_5 = arith.constant 0 : i32
    %19 = vector.broadcast %c0_i32_5 : i32 to vector<32x1xi32>
    %20 = arith.cmpi ne, %18, %19 : vector<32x1xi32>
    %c15_i32 = arith.constant 15 : i32
    %21 = vector.broadcast %c15_i32 : i32 to vector<32x1xi32>
    %22 = arith.cmpi ne, %18, %21 : vector<32x1xi32>
    %cst = arith.constant 0.000000e+00 : bf16
    %23 = vector.broadcast %cst : bf16 to vector<1x64xbf16>
    %24 = vector.extract_strided_slice %1 {offsets = [0, 0], sizes = [31, 64], strides = [1, 1]} : vector<32x64xbf16> to vector<31x64xbf16>
    %25 = tpu.concatenate %23, %24 in 0 : vector<1x64xbf16>, vector<31x64xbf16> -> vector<32x64xbf16>
    %cst_6 = arith.constant 0.000000e+00 : bf16
    %26 = vector.broadcast %cst_6 : bf16 to vector<32x64xbf16>
    %27 = vector.shape_cast %20 : vector<32x1xi1> to vector<32x1xi1>
    %28 = vector.broadcast %27 : vector<32x1xi1> to vector<32x64xi1>
    %29 = arith.select %28, %25, %26 : vector<32x64xi1>, vector<32x64xbf16>
    %cst_7 = arith.constant 0.000000e+00 : bf16
    %30 = vector.broadcast %cst_7 : bf16 to vector<1x64xbf16>
    %31 = vector.extract_strided_slice %1 {offsets = [1, 0], sizes = [31, 64], strides = [1, 1]} : vector<32x64xbf16> to vector<31x64xbf16>
    %32 = tpu.concatenate %31, %30 in 0 : vector<31x64xbf16>, vector<1x64xbf16> -> vector<32x64xbf16>
    %cst_8 = arith.constant 0.000000e+00 : bf16
    %33 = vector.broadcast %cst_8 : bf16 to vector<32x64xbf16>
    %34 = vector.shape_cast %22 : vector<32x1xi1> to vector<32x1xi1>
    %35 = vector.broadcast %34 : vector<32x1xi1> to vector<32x64xi1>
    %36 = arith.select %35, %32, %33 : vector<32x64xi1>, vector<32x64xbf16>
    %37 = tpu.concatenate %29, %1, %36 in 1 : vector<32x64xbf16>, vector<32x64xbf16>, vector<32x64xbf16> -> vector<32x192xbf16>
    %c0_9 = arith.constant 0 : index
    %c0_10 = arith.constant 0 : index
    %38 = vector.load %arg2[%c0_9, %c0_10] : memref<192x256xbf16, #tpu.memory_space<vmem>>, vector<192x256xbf16>
    %cst_11 = arith.constant dense<0.000000e+00> : vector<32x256xf32>
    %39 = tpu.matmul %37, %38, %cst_11 {dimension_numbers = #tpu.dot_dimension_numbers<[1], [0], [0], [1], [0, 0, 1, 1], [], []>} : vector<32x192xbf16>, vector<192x256xbf16>, vector<32x256xf32> -> vector<32x256xf32>
    %40 = vector.extract_strided_slice %39 {offsets = [0, 0], sizes = [32, 128], strides = [1, 1]} : vector<32x256xf32> to vector<32x128xf32>
    %c0_12 = arith.constant 0 : index
    %c0_13 = arith.constant 0 : index
    %41 = vector.load %arg3[%c0_12, %c0_13] : memref<1x128xf32, #tpu.memory_space<vmem>>, vector<1x128xf32>
    %42 = vector.broadcast %41 : vector<1x128xf32> to vector<32x128xf32>
    %43 = arith.addf %40, %42 : vector<32x128xf32>
    %cst_14 = arith.constant 0.000000e+00 : f32
    %44 = vector.broadcast %cst_14 : f32 to vector<32x128xf32>
    %45 = arith.maximumf %43, %44 : vector<32x128xf32>
    %46 = vector.extract_strided_slice %39 {offsets = [0, 128], sizes = [32, 128], strides = [1, 1]} : vector<32x256xf32> to vector<32x128xf32>
    %47 = arith.truncf %45 : vector<32x128xf32> to vector<32x128xbf16>
    %cst_15 = arith.constant 0.000000e+00 : bf16
    %48 = vector.broadcast %cst_15 : bf16 to vector<1x128xbf16>
    %49 = vector.extract_strided_slice %47 {offsets = [0, 0], sizes = [31, 128], strides = [1, 1]} : vector<32x128xbf16> to vector<31x128xbf16>
    %50 = tpu.concatenate %48, %49 in 0 : vector<1x128xbf16>, vector<31x128xbf16> -> vector<32x128xbf16>
    %cst_16 = arith.constant 0.000000e+00 : bf16
    %51 = vector.broadcast %cst_16 : bf16 to vector<32x128xbf16>
    %52 = vector.shape_cast %20 : vector<32x1xi1> to vector<32x1xi1>
    %53 = vector.broadcast %52 : vector<32x1xi1> to vector<32x128xi1>
    %54 = arith.select %53, %50, %51 : vector<32x128xi1>, vector<32x128xbf16>
    %cst_17 = arith.constant 0.000000e+00 : bf16
    %55 = vector.broadcast %cst_17 : bf16 to vector<1x128xbf16>
    %56 = vector.extract_strided_slice %47 {offsets = [1, 0], sizes = [31, 128], strides = [1, 1]} : vector<32x128xbf16> to vector<31x128xbf16>
    %57 = tpu.concatenate %56, %55 in 0 : vector<31x128xbf16>, vector<1x128xbf16> -> vector<32x128xbf16>
    %cst_18 = arith.constant 0.000000e+00 : bf16
    %58 = vector.broadcast %cst_18 : bf16 to vector<32x128xbf16>
    %59 = vector.shape_cast %22 : vector<32x1xi1> to vector<32x1xi1>
    %60 = vector.broadcast %59 : vector<32x1xi1> to vector<32x128xi1>
    %61 = arith.select %60, %57, %58 : vector<32x128xi1>, vector<32x128xbf16>
    %62 = tpu.concatenate %54, %47, %61 in 1 : vector<32x128xbf16>, vector<32x128xbf16>, vector<32x128xbf16> -> vector<32x384xbf16>
    %c0_19 = arith.constant 0 : index
    %c0_20 = arith.constant 0 : index
    %63 = vector.load %arg4[%c0_19, %c0_20] : memref<384x128xbf16, #tpu.memory_space<vmem>>, vector<384x128xbf16>
    %cst_21 = arith.constant dense<0.000000e+00> : vector<32x128xf32>
    %64 = tpu.matmul %62, %63, %cst_21 {dimension_numbers = #tpu.dot_dimension_numbers<[1], [0], [0], [1], [0, 0, 1, 1], [], []>} : vector<32x384xbf16>, vector<384x128xbf16>, vector<32x128xf32> -> vector<32x128xf32>
    %65 = arith.addf %46, %64 : vector<32x128xf32>
    %c0_22 = arith.constant 0 : index
    %c0_23 = arith.constant 0 : index
    %66 = vector.load %arg5[%c0_22, %c0_23] : memref<1x128xf32, #tpu.memory_space<vmem>>, vector<1x128xf32>
    %67 = vector.broadcast %66 : vector<1x128xf32> to vector<32x128xf32>
    %68 = arith.addf %65, %67 : vector<32x128xf32>
    %cst_24 = arith.constant 0.000000e+00 : f32
    %69 = vector.broadcast %cst_24 : f32 to vector<32x128xf32>
    %70 = arith.maximumf %68, %69 : vector<32x128xf32>
    %71 = vector.shape_cast %70 : vector<32x128xf32> to vector<2x16x128xf32>
    %c0_25 = arith.constant 0 : index
    %c0_26 = arith.constant 0 : index
    %c0_27 = arith.constant 0 : index
    %72 = vector.load %arg6[%c0_25, %c0_26, %c0_27] : memref<2x16x128xf32, #tpu.memory_space<vmem>>, vector<2x16x128xf32>
    tpu.vector_store %arg6[%c0_25, %c0_26, %c0_27], %71 {strides = array<i32>} : memref<2x16x128xf32, #tpu.memory_space<vmem>>, vector<2x16x128xf32>,
    return
  }
  func.func @transform_0(%arg0: i32) -> (i32, i32, i32) {
    %c0_i32 = arith.constant 0 : i32
    %c0_i32_0 = arith.constant 0 : i32
    %c0_i32_1 = arith.constant 0 : i32
    return %arg0, %c0_i32, %c0_i32_0 : i32, i32, i32
  }
  func.func @transform_1(%arg0: i32) -> (i32, i32) {
    %c0_i32 = arith.constant 0 : i32
    %c0_i32_0 = arith.constant 0 : i32
    %c0_i32_1 = arith.constant 0 : i32
    return %c0_i32, %c0_i32_0 : i32, i32
  }
  func.func @transform_2(%arg0: i32) -> (i32, i32) {
    %c0_i32 = arith.constant 0 : i32
    %c0_i32_0 = arith.constant 0 : i32
    %c0_i32_1 = arith.constant 0 : i32
    return %c0_i32, %c0_i32_0 : i32, i32
  }
  func.func @transform_3(%arg0: i32) -> (i32, i32) {
    %c0_i32 = arith.constant 0 : i32
    %c0_i32_0 = arith.constant 0 : i32
    %c0_i32_1 = arith.constant 0 : i32
    return %c0_i32, %c0_i32_0 : i32, i32
  }
  func.func @transform_4(%arg0: i32) -> (i32, i32) {
    %c0_i32 = arith.constant 0 : i32
    %c0_i32_0 = arith.constant 0 : i32
    %c0_i32_1 = arith.constant 0 : i32
    return %c0_i32, %c0_i32_0 : i32, i32
  }
  func.func @transform_5(%arg0: i32) -> (i32, i32, i32) {
    %c0_i32 = arith.constant 0 : i32
    %c0_i32_0 = arith.constant 0 : i32
    %c0_i32_1 = arith.constant 0 : i32
    return %arg0, %c0_i32, %c0_i32_0 : i32, i32, i32
  }
}

</mosaic_0001>

<bundles_post_ra>
// kernel: tile.18
= control target key start
LH: loop header
LB: loop body
LE: loop exit
PB: predicated region body
PF: predicated region fallthrough
CT: control target
= control target key end

     0   :  { %s28_s0 = inlined_call_operand.vmem [shape: f32[8], index: 0, kind: input, shape index: {}]   ;;  %s29_s1 = inlined_call_operand.vmem [shape: f32[16,8], index: 1, kind: output, shape index: {}]  }
   0x1   :  { %v4_v0 = vld [vmem:[%s28_s0] ss:$0 sm:$0xff] }
   0x2   :  { %5 = vst [vmem:[%s29_s1] sm:$0xff] %v4_v0  ;;  %8 = vst [vmem:[%s29_s1 + $0x8] sm:$0xff] %v4_v0 }

// kernel: tile.19
= control target key start
LH: loop header
LB: loop body
LE: loop exit
PB: predicated region body
PF: predicated region fallthrough
CT: control target
= control target key end

     0   :  { %s133_s10 = smov 120   ;;  %s134_s11 = smov 104   ;;  %vm3_vm0 = vcmask 64512   ;;  %vm9_vm1 = vcmask 1048512   ;;  %vm15_vm2 = vcmask 982912   ;;  %vm21_vm3 = vcmask 917312   ;;  %s209_s0 = inlined_call_operand.vmem [shape: f32[16,8], index: 0, kind: input, shape index: {}]   ;;  %s210_s1 = inlined_call_operand.vmem [shape: f32[1,128], index: 1, kind: output, shape index: {}]  }
   0x1   :  { %v103_v0 = vld [vmem:[%s209_s0 + $0xf] sm:$0x1]   ;;  %v105_v1 = vld [vmem:[%s209_s0 + $0xd] sm:$0x1]   ;;  %v104_v2 = vld [vmem:[%s209_s0 + $0xe] sm:$0x1]  }
   0x2   :  { %7 = vrot.lane.b32.xlu0 %v103_v0, %s133_s10  ;;  %19 = vrot.lane.b32.xlu1 %v105_v1, %s134_s11  ;;  %v106_v3 = vld [vmem:[%s209_s0 + $0xc] sm:$0x1]   ;;  %s135_s16 = smov 112   ;;  %s136_s17 = smov 96   ;;  %v107_v4 = vld [vmem:[%s209_s0 + $0xb] sm:$0x1]  }
   0x3   :  { %v108_v5 = vld [vmem:[%s209_s0 + $0xa] sm:$0x1]   ;;  %v2_v6 = vld [vmem:[%s209_s0] sm:$0x1]   ;;  %s137_s24 = smov 88   ;;  %s138_s25 = smov 80  }
   0x4   :  { %4 = vst.msk [vmem:[#allocation0] sm:$0x1] %vm3_vm0, %v2_v6   ;;  %v109_v7 = vld [vmem:[%s209_s0 + $0x9] sm:$0x1]   ;;  %v110_v8 = vld [vmem:[%s209_s0 + $0x8] sm:$0x1]  }
   0x5   :  { %s139_s30 = smov 72   ;;  %s140_s2 = smov 64   ;;  %v111_v9 = vld [vmem:[%s209_s0 + $0x7] sm:$0x1]   ;;  %v112_v10 = vld [vmem:[%s209_s0 + $0x6] sm:$0x1]  }
   0x6   :  { %13 = vrot.lane.b32.xlu0 %v104_v2, %s135_s16  ;;  %25 = vrot.lane.b32.xlu1 %v106_v3, %s136_s17  ;;  %s141_s7 = smov 56   ;;  %s142_s8 = smov 48   ;;  %v113_v11 = vld [vmem:[%s209_s0 + $0x5] sm:$0x1]   ;;  %v114_v12 = vld [vmem:[%s209_s0 + $0x4] sm:$0x1]  }
   0x7   :  { %s143_s13 = smov 40   ;;  %s144_s14 = smov 32   ;;  %v115_v13 = vld [vmem:[%s209_s0 + $0x3] sm:$0x1]   ;;  %v116_v14 = vld [vmem:[%s209_s0 + $0x2] sm:$0x1]  }
   0x8   :  { %s145_s19 = smov 24   ;;  %s146_s20 = smov 16   ;;  %v117_v15 = vld [vmem:[%s209_s0 + $0x1] sm:$0x1]   ;;  %vm27_vm4 = vcmask 851712   ;;  %vm33_vm5 = vcmask 786112  }
   0x9   :  { %s147_s0 = smov 8   ;;  %vm39_vm6 = vcmask 720512   ;;  %vm45_vm7 = vcmask 654912   ;;  %vm51_vm8 = vcmask 589312   ;;  %vm57_vm9 = vcmask 523712  }
   0xa   :  { %31 = vrot.lane.b32.xlu0 %v107_v4, %s137_s24  ;;  %37 = vrot.lane.b32.xlu1 %v108_v5, %s138_s25  ;;  %vm63_vm10 = vcmask 458112   ;;  %vm69_vm11 = vcmask 392512   ;;  %vm75_vm12 = vcmask 326912   ;;  %vm81_vm13 = vcmask 261312  }
   0xb   :  { %vm87_vm14 = vcmask 195712   ;;  %vm93_vm15 = vcmask 130112  }
   0xe   :  { %43 = vrot.lane.b32.xlu0 %v109_v7, %s139_s30  ;;  %49 = vrot.lane.b32.xlu1 %v110_v8, %s140_s2 }
  0x12   :  { %55 = vrot.lane.b32.xlu0 %v111_v9, %s141_s7  ;;  %61 = vrot.lane.b32.xlu1 %v112_v10, %s142_s8 }
  0x16   :  { %67 = vrot.lane.b32.xlu0 %v113_v11, %s143_s13  ;;  %73 = vrot.lane.b32.xlu1 %v114_v12, %s144_s14 }
  0x1a   :  { %79 = vrot.lane.b32.xlu0 %v115_v13, %s145_s19  ;;  %85 = vrot.lane.b32.xlu1 %v116_v14, %s146_s20 }
  0x1e   :  { %91 = vrot.lane.b32.xlu0 %v117_v15, %s147_s0 }
  0x74   :  { %v8_v16 = vpop.permute.xlu0 %7   ;;  %v20_v17 = vpop.permute.xlu1 %19  }
  0x75   :  { %10 = vst.msk [vmem:[#allocation0] sm:$0x1] %vm9_vm1, %v8_v16  }
  0x78   :  { %v14_v18 = vpop.permute.xlu0 %13   ;;  %v26_v19 = vpop.permute.xlu1 %25  }
  0x79   :  { %16 = vst.msk [vmem:[#allocation0] sm:$0x1] %vm15_vm2, %v14_v18  }
  0x7a   :  { %22 = vst.msk [vmem:[#allocation0] sm:$0x1] %vm21_vm3, %v20_v17  }
  0x7b   :  { %28 = vst.msk [vmem:[#allocation0] sm:$0x1] %vm27_vm4, %v26_v19  }
  0x7c   :  { %v32_v20 = vpop.permute.xlu0 %31   ;;  %v38_v21 = vpop.permute.xlu1 %37  }
  0x7d   :  { %34 = vst.msk [vmem:[#allocation0] sm:$0x1] %vm33_vm5, %v32_v20  }
  0x7e   :  { %40 = vst.msk [vmem:[#allocation0] sm:$0x1] %vm39_vm6, %v38_v21  }
  0x80   :  { %v44_v22 = vpop.permute.xlu0 %43   ;;  %v50_v23 = vpop.permute.xlu1 %49  }
  0x81   :  { %46 = vst.msk [vmem:[#allocation0] sm:$0x1] %vm45_vm7, %v44_v22  }
  0x82   :  { %52 = vst.msk [vmem:[#allocation0] sm:$0x1] %vm51_vm8, %v50_v23  }
  0x84   :  { %v56_v24 = vpop.permute.xlu0 %55   ;;  %v62_v25 = vpop.permute.xlu1 %61  }
  0x85   :  { %58 = vst.msk [vmem:[#allocation0] sm:$0x1] %vm57_vm9, %v56_v24  }
  0x86   :  { %64 = vst.msk [vmem:[#allocation0] sm:$0x1] %vm63_vm10, %v62_v25  }
  0x88   :  { %v68_v26 = vpop.permute.xlu0 %67   ;;  %v74_v27 = vpop.permute.xlu1 %73  }
  0x89   :  { %70 = vst.msk [vmem:[#allocation0] sm:$0x1] %vm69_vm11, %v68_v26  }
  0x8a   :  { %76 = vst.msk [vmem:[#allocation0] sm:$0x1] %vm75_vm12, %v74_v27  }
  0x8c   :  { %v80_v28 = vpop.permute.xlu0 %79   ;;  %v86_v29 = vpop.permute.xlu1 %85  }
  0x8d   :  { %82 = vst.msk [vmem:[#allocation0] sm:$0x1] %vm81_vm13, %v80_v28  }
  0x8e   :  { %88 = vst.msk [vmem:[#allocation0] sm:$0x1] %vm87_vm14, %v86_v29  }
  0x90   :  { %v92_v30 = vpop.permute.xlu0 %91  }
  0x91   :  { %94 = vst.msk [vmem:[#allocation0] sm:$0x1] %vm93_vm15, %v92_v30  }
  0x98   :  { %v99_v31 = vld [vmem:[#allocation0] sm:$0x1] }
  0x99   :  { %102 = vst [vmem:[%s210_s1] sm:$0x1] %v99_v31 }

// kernel: resnet_basic_block.1
= control target key start
LH: loop header
LB: loop body
LE: loop exit
PB: predicated region body
PF: predicated region fallthrough
CT: control target
= control target key end

     0   :  { %v27_v1 = vlaneseq  ;;  %s947_s22 = smov 64   ;;  %vm145_vm0 = vsmask.f32 7424  ;;  %vm98_vm2 = vsmask.f32 256  ;;  %vm948_vm3 = vmmov 1   ;;  %s1258_s0 = inlined_call_operand.vmem [shape: bf16[2,16,64], index: 0, kind: input, shape index: {}]   ;;  %s1259_s1 = inlined_call_operand.vmem [shape: bf16[192,256], index: 1, kind: input, shape index: {}]   ;;  %s1260_s3 = inlined_call_operand.vmem [shape: bf16[384,128], index: 3, kind: input, shape index: {}]   ;;  %s1261_s2 = inlined_call_operand.vmem [shape: f32[1,128], index: 2, kind: input, shape index: {}]   ;;  %s1262_s4 = inlined_call_operand.vmem [shape: f32[1,128], index: 4, kind: input, shape index: {}]   ;;  %s1263_s5 = inlined_call_operand.vmem [shape: f32[2,16,128], index: 5, kind: output, shape index: {}]  }
   0x1   :  { %v885_v0 = vld [vmem:[%s1258_s0] sm:$0xff]   ;;  %v886_v2 = vld [vmem:[%s1258_s0 + $0x8] sm:$0xff]   ;;  %v887_v3 = vld [vmem:[%s1259_s1 + $0x74] ss:$8 sps:$4 sm:$0xff]   ;;  %v949_v38 = vmov 0   ;;  %vm186_vm8 = vcmask 523264  }
   0x2   :  { %182 = vrot.lane.b32.xlu0 %v885_v0, %s947_s22  ;;  %v889_v4 = vld [vmem:[%s1259_s1 + $0x70] ss:$8 sps:$4 sm:$0xff]   ;;  %v100_v5 = vshrl.u32 %v885_v0, 16  ;;  %345 = vmatprep.subr.bf16.mxu0 %v887_v3  ;;  %v890_v6 = vld [vmem:[%s1259_s1 + $0x64] ss:$8 sps:$4 sm:$0xff]   ;;  %v28_v7 = vshrl.u32 %v27_v1, 7  ;;  %vm128_vm4 = vmpackc.low %vm948_vm3, %vm948_vm3 }
   0x3   :  { %346 = vmatpush1.bf16.msra.mxu0 %v889_v4  ;;  %v892_v8 = vld [vmem:[%s1259_s1 + $0x60] ss:$8 sps:$4 sm:$0xff]   ;;  %v893_v9 = vld [vmem:[%s1259_s1 + $0x54] ss:$8 sps:$4 sm:$0xff]   ;;  %v103_v10 = vshll.u32 %v885_v0, 16  ;;  %v110_v11 = vshll.u32 %v886_v2, 16 }
   0x4   :  { %347 = vmatprep.subr.bf16.mxu0 %v890_v6  ;;  %v102_v12 = vrot.slane %v100_v5, 7  ;;  %v29_v13 = vadd.s32 8, %v28_v7  ;;  %v895_v14 = vld [vmem:[%s1259_s1 + $0x50] ss:$8 sps:$4 sm:$0xff]   ;;  %v896_v16 = vld [vmem:[%s1259_s1 + $0x44] ss:$8 sps:$4 sm:$0xff]  }
   0x5   :  { %v148_v17 = vrot.slane %v110_v11, 1  ;;  %v107_v18 = vshrl.u32 %v886_v2, 16  ;;  %v31_v20 = vadd.s32 24, %v28_v7  ;;  %v898_v21 = vld [vmem:[%s1259_s1 + $0x40] ss:$8 sps:$4 sm:$0xff]   ;;  %v146_v22 = vrot.slane %v103_v10, 1 }
   0x6   :  { %184 = vrot.lane.b32.xlu0 %v886_v2, %s947_s22  ;;  %v1004_v15 = vor.u32 %v103_v10, %v102_v12  ;;  %v43_v19 = vand.u32 15, %v29_v13  ;;  %v36_v23 = vand.u32 15, %v28_v7  ;;  %v899_v25 = vld [vmem:[%s1259_s1 + $0x34] ss:$8 sps:$4 sm:$0xff]   ;;  %v30_v27 = vadd.s32 16, %v28_v7  ;;  %v927_v59 = vld [vmem:[%s1260_s3 + $0x68] sm:$0xff]  }
   0x7   :  { %348 = vmatpush1.bf16.msra.mxu0 %v892_v8  ;;  %v1012_v24 = vor.u32 %v148_v17, %v107_v18  ;;  %v109_v26 = vrot.slane %v107_v18, 7  ;;  %v901_v28 = vld [vmem:[%s1259_s1 + $0x30] ss:$8 sps:$4 sm:$0xff]   ;;  %v57_v30 = vand.u32 15, %v31_v20  ;;  %v902_v32 = vld [vmem:[%s1259_s1 + $0x24] ss:$8 sps:$4 sm:$0xff]   ;;  %v147_v33 = vor.u32 %v146_v22, %v100_v5 }
   0x8   :  { %349 = vmatprep.subr.bf16.mxu0 %v893_v9  ;;  %vm1020_vm1 = vcmp.ne.s32.totalorder %v43_v19, 15  ;;  %v50_v34 = vand.u32 15, %v30_v27  ;;  %vm1027_vm5 = vcmp.ne.s32.totalorder %v36_v23, 0  ;;  %v904_v37 = vld [vmem:[%s1259_s1 + $0x20] ss:$8 sps:$4 sm:$0xff]   ;;  %v1037_v39 = vsel %vm128_vm4, 65537, %v949_v38 }
   0x9   :  { %v112_v31 = vor.u32 %v110_v11, %v109_v26  ;;  %vm165_vm6 = vmpackc.low %vm1020_vm1, %vm1020_vm1  ;;  %v923_v40 = vld [vmem:[%s1260_s3 + $0x78] sm:$0xff]   ;;  %vm1045_vm7 = vcmp.ne.s32.totalorder %v57_v30, 15  ;;  %v149_v44 = vsel %vm145_vm0, %v147_v33, %v148_v17  ;;  %v925_v49 = vld [vmem:[%s1260_s3 + $0x70] sm:$0xff]   ;;  %vm116_vm14 = vcmask 1040384  }
   0xa   :  { %v169_v41 = vsel %vm165_vm6, 65537, %v949_v38  ;;  %v924_v43 = vld [vmem:[%s1260_s3 + $0x38] sm:$0xff]   ;;  %vm127_vm9 = vmpackc.low %vm1027_vm5, %vm1027_vm5  ;;  %vm1057_vm10 = vcmp.ne.s32.totalorder %v50_v34, 0  ;;  %824 = vmatprep.subr.bf16.mxu1 %v923_v40  ;;  %v926_v53 = vld [vmem:[%s1260_s3 + $0x30] sm:$0xff]   ;;  %vm153_vm15 = vcmask 1047552  }
   0xb   :  { %350 = vmatpush1.bf16.msra.mxu0 %v895_v14  ;;  %v1032_v36 = vsel %vm98_vm2, %v102_v12, %v112_v31  ;;  %v766_v45 = vcombine.low %v1037_v39, %v169_v41  ;;  %v905_v47 = vld [vmem:[%s1259_s1 + $0x14] ss:$8 sps:$4 sm:$0xff]   ;;  %v131_v48 = vsel %vm127_vm9, 65537, %v949_v38  ;;  %825 = vmatpush3.bf16.msra.mxu1 %v924_v43  ;;  %v907_v50 = vld [vmem:[%s1259_s1 + $0x10] ss:$8 sps:$4 sm:$0xff]   ;;  %vm167_vm12 = vmpackc.low %vm1045_vm7, %vm1045_vm7 }
   0xc   :  { %351 = vmatprep.subr.bf16.mxu0 %v896_v16  ;;  %v764_v52 = vcombine.low %v131_v48, %v1037_v39  ;;  %v171_v55 = vsel %vm167_vm12, 65537, %v949_v38  ;;  %vm129_vm13 = vmpackc.low %vm1057_vm10, %vm1057_vm10  ;;  %826 = vmatprep.subr.bf16.mxu1 %v925_v49  ;;  %v908_v56 = vld [vmem:[%s1259_s1 + $0x4] ss:$8 sps:$4 sm:$0xff]   ;;  %v910_v62 = vld [vmem:[%s1259_s1] ss:$8 sps:$4 sm:$0xff]  }
   0xd   :  { %vm1070_vm11 = vcmp.ne.s16.totalorder %v766_v45, 0  ;;  %v767_v57 = vcombine.low %v1037_v39, %v171_v55  ;;  %v133_v58 = vsel %vm129_vm13, 65537, %v949_v38  ;;  %v928_v61 = vld [vmem:[%s1260_s3 + $0x28] sm:$0xff]   ;;  %v929_v63 = vld [vmem:[%s1260_s3 + $0x60] sm:$0xff]   ;;  %v911_v0 = vld [vmem:[%s1259_s1 + $0xb4] ss:$8 sps:$4 sm:$0xff]  }
   0xe   :  { %v180_v54 = vsel %vm1070_vm11, %v149_v44, 0  ;;  %v765_v60 = vcombine.low %v133_v58, %v1037_v39  ;;  %v930_v1 = vld [vmem:[%s1260_s3 + $0x20] sm:$0xff]   ;;  %v913_v2 = vld [vmem:[%s1259_s1 + $0xb0] ss:$8 sps:$4 sm:$0xff]   ;;  %v917_v5 = vld [vmem:[%s1259_s1 + $0x94] ss:$8 sps:$4 sm:$0xff]  }
   0xf   :  { %352 = vmatpush1.bf16.msra.mxu0 %v898_v21  ;;  %792 = vmatprep.mubr.msk.bf16.mxu0 %vm186_vm8, %v180_v54  ;;  %v914_v3 = vld [vmem:[%s1259_s1 + $0xa4] ss:$8 sps:$4 sm:$0xff]   ;;  %v916_v4 = vld [vmem:[%s1259_s1 + $0xa0] ss:$8 sps:$4 sm:$0xff]   ;;  %v919_v6 = vld [vmem:[%s1259_s1 + $0x90] ss:$8 sps:$4 sm:$0xff]  }
  0x10   :  { %353 = vmatprep.subr.bf16.mxu0 %v899_v25  ;;  %827 = vmatpush3.bf16.msra.mxu1 %v926_v53  ;;  %v920_v7 = vld [vmem:[%s1259_s1 + $0x84] ss:$8 sps:$4 sm:$0xff]   ;;  %v922_v8 = vld [vmem:[%s1259_s1 + $0x80] ss:$8 sps:$4 sm:$0xff]   ;;  %vm1132_vm1 = vmand %vm116_vm14, %vm98_vm2  ;;  %vm1144_vm4 = vcmp.ne.s16.totalorder %v764_v52, 0  ;;  %vm1151_vm5 = vcmp.ne.s16.totalorder %v767_v57, 0 }
  0x11   :  { %828 = vmatprep.subr.bf16.mxu1 %v927_v59  ;;  %vm1137_vm3 = vmand %vm153_vm15, %vm145_vm0  ;;  %v118_v11 = vsel %vm1132_vm1, 0, %v1004_v15  ;;  %vm1160_vm6 = vcmp.ne.s16.totalorder %v765_v60, 0  ;;  %v931_v23 = vld [vmem:[%s1260_s3 + $0x58] sm:$0xff]   ;;  %v933_v25 = vld [vmem:[%s1260_s3 + $0x50] sm:$0xff]  }
  0x12   :  { %v155_v13 = vsel %vm1137_vm3, %v1012_v24, 0  ;;  %v143_v16 = vsel %vm1144_vm4, %v118_v11, 0  ;;  %v144_v21 = vsel %vm1160_vm6, %v1032_v36, 0  ;;  %v932_v24 = vld [vmem:[%s1260_s3 + $0x18] sm:$0xff]   ;;  %v934_v26 = vld [vmem:[%s1260_s3 + $0x10] sm:$0xff]   ;;  %v935_v27 = vld [vmem:[%s1260_s3 + $0x48] sm:$0xff]  }
  0x13   :  { %354 = vmatpush1.bf16.msra.mxu0 %v901_v28  ;;  %v181_v18 = vsel %vm1151_vm5, %v155_v13, 0  ;;  %v936_v28 = vld [vmem:[%s1260_s3 + $0x8] sm:$0xff]   ;;  %v937_v29 = vld [vmem:[%s1260_s3 + $0x40] sm:$0xff]   ;;  %v939_v31 = vld [vmem:[%s1260_s3 + $0xb8] sm:$0xff]  }
  0x14   :  { %355 = vmatprep.subr.bf16.mxu0 %v902_v32  ;;  %829 = vmatpush3.bf16.msra.mxu1 %v928_v61  ;;  %v938_v30 = vld [vmem:[%s1260_s3] sm:$0xff]   ;;  %v940_v54 = vld [vmem:[%s1260_s3 + $0xb0] sm:$0xff]   ;;  %v941_v60 = vld [vmem:[%s1260_s3 + $0xa8] sm:$0xff]  }
  0x15   :  { %830 = vmatprep.subr.bf16.mxu1 %v929_v63  ;;  %v794_v33 = vld [vmem:[%s1261_s2] ss:$0 sm:$0xff] }
  0x16   :  { %v946_v51 = vld [vmem:[%s1260_s3 + $0x80] sm:$0xff]  }
  0x17   :  { %356 = vmatpush1.bf16.msra.mxu0 %v904_v37  ;;  %v823_v10 = vld [vmem:[%s1262_s4] ss:$0 sm:$0xff] }
  0x18   :  { %357 = vmatprep.subr.bf16.mxu0 %v905_v47  ;;  %831 = vmatpush3.bf16.msra.mxu1 %v930_v1  ;;  %v942_v1 = vld [vmem:[%s1260_s3 + $0xa0] sm:$0xff]  }
  0x19   :  { %832 = vmatprep.subr.bf16.mxu1 %v931_v23 }
  0x1b   :  { %358 = vmatpush1.bf16.msra.mxu0 %v907_v50 }
  0x1c   :  { %359 = vmatprep.subr.bf16.mxu0 %v908_v56  ;;  %833 = vmatpush3.bf16.msra.mxu1 %v932_v24 }
  0x1d   :  { %834 = vmatprep.subr.bf16.mxu1 %v933_v25 }
  0x1f   :  { %360 = vmatpush1.bf16.msra.mxu0 %v910_v62 }
  0x20   :  { %369 = vmatprep.subr.bf16.mxu0 %v911_v0  ;;  %835 = vmatpush3.bf16.msra.mxu1 %v934_v26 }
  0x21   :  { %836 = vmatprep.subr.bf16.mxu1 %v935_v27 }
  0x23   :  { %370 = vmatpush2.bf16.msra.mxu0 %v913_v2 }
  0x24   :  { %371 = vmatprep.subr.bf16.mxu0 %v914_v3  ;;  %837 = vmatpush3.bf16.msra.mxu1 %v936_v28 }
  0x25   :  { %838 = vmatprep.subr.bf16.mxu1 %v937_v29 }
  0x27   :  { %372 = vmatpush2.bf16.msra.mxu0 %v916_v4  ;;  %v943_v4 = vld [vmem:[%s1260_s3 + $0x98] sm:$0xff]  }
  0x28   :  { %373 = vmatprep.subr.bf16.mxu0 %v917_v5  ;;  %839 = vmatpush3.bf16.msra.mxu1 %v938_v30  ;;  %v944_v5 = vld [vmem:[%s1260_s3 + $0x90] sm:$0xff]  }
  0x29   :  { %862 = vmatprep.subr.bf16.mxu1 %v939_v31 }
  0x2b   :  { %374 = vmatpush2.bf16.msra.mxu0 %v919_v6  ;;  %v945_v6 = vld [vmem:[%s1260_s3 + $0x88] sm:$0xff]  }
  0x2c   :  { %375 = vmatprep.subr.bf16.mxu0 %v920_v7 }
  0x2f   :  { %376 = vmatpush2.bf16.msra.mxu0 %v922_v8 }
  0x74   :  { %v183_v17 = vpop.permute.xlu0 %182 }
  0x75   :  { %v189_v15 = vsel %vm186_vm8, %v143_v16, %v183_v17 }
  0x76   :  { %378 = vmatmul.mubr.bf16.vlgmr.msra.gmra.mxu0 %v189_v15 }
  0x77   :  { %793 = vmatprep.mubr.msk.bf16.mxu0 %vm186_vm8, %v181_v18 }
  0x78   :  { %v185_v20 = vpop.permute.xlu0 %184 }
  0x79   :  { %v193_v22 = vsel %vm186_vm8, %v144_v21, %v185_v20 }
  0x7e   :  { %388 = vmatmul.mubr.bf16.gmra.mxu0 %v193_v22 }
 0x136   :  { %v379_v32 = vpop.f32.mrf.mxu0 }
 0x137   :  { %v405_v35 = vadd.f32 %v794_v33, %v379_v32 }
 0x138   :  { %v1199_v34 = vpop.f32.mrf.mxu0 }
 0x139   :  { %v409_v39 = vmax.f32 %v405_v35, 0.0 }
 0x13a   :  { %v383_v36 = vpop.f32.mrf.mxu0 }
 0x13b   :  { %v406_v37 = vadd.f32 %v794_v33, %v383_v36 }
 0x13c   :  { %v1201_v38 = vpop.f32.mrf.mxu0 }
 0x13d   :  { %v410_v40 = vmax.f32 %v406_v37, 0.0 }
 0x13e   :  { %v389_v41 = vpop.f32.mrf.mxu0 }
 0x13f   :  { %v413_v42 = vpack.c.bf16 %v410_v40, %v409_v39  ;;  %v407_v43 = vadd.f32 %v794_v33, %v389_v41 }
 0x140   :  { %v1203_v44 = vpop.f32.mrf.mxu0 }
 0x141   :  { %v416_v45 = vshrl.u32 %v413_v42, 16  ;;  %669 = vmatprep.mubr.bf16.mxu1 %v413_v42  ;;  %v411_v47 = vmax.f32 %v407_v43, 0.0  ;;  %v419_v50 = vshll.u32 %v413_v42, 16 }
 0x142   :  { %v393_v46 = vpop.f32.mrf.mxu0 }
 0x143   :  { %v408_v48 = vadd.f32 %v794_v33, %v393_v46  ;;  %v418_v49 = vrot.slane %v416_v45, 7  ;;  %v435_v59 = vrot.slane %v419_v50, 1 }
 0x145   :  { %v412_v52 = vmax.f32 %v408_v48, 0.0  ;;  %v421_v53 = vor.u32 %v419_v50, %v418_v49  ;;  %v436_v0 = vor.u32 %v435_v59, %v416_v45 }
 0x147   :  { %v414_v55 = vpack.c.bf16 %v412_v52, %v411_v47  ;;  %v432_v56 = vsel %vm1132_vm1, 0, %v421_v53 }
 0x148   :  { %819 = vmatmul.mubr.msk.bf16.vlgmr.msra.gmra.mxu1 %vm1144_vm4, %v432_v56 }
 0x149   :  { %v423_v57 = vshrl.u32 %v414_v55, 16  ;;  %v426_v58 = vshll.u32 %v414_v55, 16  ;;  %863 = vmatpush3.bf16.msra.mxu1 %v939_v31  ;;  %677 = vmatprep.mubr.bf16.mxu1 %v414_v55  ;;  %v395_v31 = vpop.f32.mrf.mxu0 }
 0x14a   :  { %864 = vmatprep.subr.bf16.mxu1 %v940_v54 }
 0x14b   :  { %v425_v61 = vrot.slane %v423_v57, 7  ;;  %v437_v62 = vrot.slane %v426_v58, 1 }
 0x14d   :  { %865 = vmatpush3.bf16.msra.mxu1 %v940_v54  ;;  %v428_v63 = vor.u32 %v426_v58, %v425_v61  ;;  %v438_v3 = vsel %vm145_vm0, %v436_v0, %v437_v62  ;;  %v439_v7 = vor.u32 %v437_v62, %v423_v57 }
 0x14e   :  { %866 = vmatprep.subr.bf16.mxu1 %v941_v60 }
 0x14f   :  { %v429_v2 = vsel %vm98_vm2, %v418_v49, %v428_v63  ;;  %v442_v8 = vsel %vm1137_vm3, %v439_v7, 0 }
 0x150   :  { %820 = vmatmul.mubr.msk.bf16.gmra.mxu1 %vm1160_vm6, %v429_v2 }
 0x151   :  { %867 = vmatpush3.bf16.msra.mxu1 %v941_v60  ;;  %878 = vmatprep.mubr.msk.bf16.mxu1 %vm1070_vm11, %v438_v3 }
 0x152   :  { %868 = vmatprep.subr.bf16.mxu1 %v942_v1 }
 0x155   :  { %869 = vmatpush3.bf16.msra.mxu1 %v942_v1 }
 0x156   :  { %870 = vmatprep.subr.bf16.mxu1 %v943_v4 }
 0x159   :  { %871 = vmatpush3.bf16.msra.mxu1 %v943_v4 }
 0x15a   :  { %872 = vmatprep.subr.bf16.mxu1 %v944_v5 }
 0x15d   :  { %873 = vmatpush3.bf16.msra.mxu1 %v944_v5 }
 0x15e   :  { %874 = vmatprep.subr.bf16.mxu1 %v945_v6 }
 0x161   :  { %875 = vmatpush3.bf16.msra.mxu1 %v945_v6 }
 0x162   :  { %876 = vmatprep.subr.bf16.mxu1 %v946_v51 }
 0x165   :  { %877 = vmatpush3.bf16.msra.mxu1 %v946_v51 }
 0x168   :  { %879 = vmatmul.mubr.msk.bf16.vlgmr.msra.gmra.mxu1 %vm1151_vm5, %v442_v8 }
 0x208   :  { %v840_v9 = vpop.f32.mrf.mxu1 }
 0x20a   :  { %v841_v11 = vpop.f32.mrf.mxu1 }
 0x20b   :  { %v842_v21 = vadd.f32 %v841_v11, %v840_v9 }
 0x20c   :  { %v843_v12 = vpop.f32.mrf.mxu1 }
 0x20e   :  { %v844_v13 = vpop.f32.mrf.mxu1 }
 0x20f   :  { %v845_v27 = vadd.f32 %v844_v13, %v843_v12 }
 0x210   :  { %v846_v16 = vpop.f32.mrf.mxu1 }
 0x212   :  { %v847_v17 = vpop.f32.mrf.mxu1 }
 0x213   :  { %v848_v19 = vadd.f32 %v847_v17, %v846_v16 }
 0x214   :  { %v849_v18 = vpop.f32.mrf.mxu1 }
 0x216   :  { %v850_v15 = vpop.f32.mrf.mxu1 }
 0x217   :  { %v851_v24 = vadd.f32 %v850_v15, %v849_v18 }
 0x228   :  { %v880_v20 = vpop.f32.mrf.mxu1 }
 0x229   :  { %v729_v22 = vadd.f32 %v880_v20, %v848_v19 }
 0x22a   :  { %v720_v23 = vpop.f32.mrf.mxu1 }
 0x22b   :  { %v737_v14 = vadd.f32 %v729_v22, %v1203_v44  ;;  %v721_v25 = vadd.f32 %v842_v21, %v720_v23 }
 0x22c   :  { %v881_v26 = vpop.f32.mrf.mxu1 }
 0x22d   :  { %v748_v28 = vadd.f32 %v823_v10, %v737_v14  ;;  %v735_v29 = vadd.f32 %v721_v25, %v1199_v34  ;;  %v732_v30 = vadd.f32 %v881_v26, %v851_v24 }
 0x22e   :  { %v723_v32 = vpop.f32.mrf.mxu1 }
 0x22f   :  { %v752_v33 = vmax.f32 %v748_v28, 0.0  ;;  %v746_v35 = vadd.f32 %v823_v10, %v735_v29  ;;  %v738_v36 = vadd.f32 %v732_v30, %v395_v31  ;;  %v724_v37 = vadd.f32 %v845_v27, %v723_v32 }
 0x231   :  { %756 = vst [vmem:[%s1263_s5 + $0x10] sm:$0xff] %v752_v33  ;;  %v750_v39 = vmax.f32 %v746_v35, 0.0  ;;  %v749_v40 = vadd.f32 %v823_v10, %v738_v36  ;;  %v736_v41 = vadd.f32 %v724_v37, %v1201_v38 }
 0x233   :  { %754 = vst [vmem:[%s1263_s5] sm:$0xff] %v750_v39  ;;  %v753_v34 = vmax.f32 %v749_v40, 0.0  ;;  %v747_v42 = vadd.f32 %v823_v10, %v736_v41 }
 0x235   :  { %757 = vst [vmem:[%s1263_s5 + $0x18] sm:$0xff] %v753_v34  ;;  %v751_v43 = vmax.f32 %v747_v42, 0.0 }
 0x237   :  { %755 = vst [vmem:[%s1263_s5 + $0x8] sm:$0xff] %v751_v43 }

</bundles_post_ra>
